<compile_context>
chip_gen: v7x
topology: tpu7x:2x2x1
jax: 0.10.0
libtpu: 0.0.40
codegen_flags: <defaults>
</compile_context>

<pallas_src>
import jax
import jax.numpy as jnp
from jax.experimental import pallas as pl
from jax.experimental.pallas import tpu as pltpu


def mlp_kernel(x_ref, w1_ref, b1_ref, w2_ref, b2_ref, w3_ref, b3_ref, o_ref):
    """Fused 3-layer MLP on one feature-major batch tile.

    Shapes (T = batch tile, lane axis):
        x_ref  : (3,  T)        w1_ref : (64, 3)   b1_ref : (64, 1)
        h1     : (64, T)        w2_ref : (10, 64)  b2_ref : (10, 1)
        h2     : (10, T)        w3_ref : (2, 10)   b3_ref : (2, 1)
        o_ref  : (2,  T)
    """
    x = x_ref[...]  # already f32; no redundant cast

    # NOTE: layer 1 has K=3 so the MXU is near-idle, but after the layout fix
    # the kernel is memory/step-overhead bound, not contraction bound.
    h1 = jnp.dot(w1_ref[...], x, preferred_element_type=jnp.float32) + b1_ref[...]
    h1 = jnp.maximum(h1, 0.0)                                   # ReLU

    h2 = jnp.dot(w2_ref[...], h1, preferred_element_type=jnp.float32) + b2_ref[...]
    h2 = jnp.maximum(h2, 0.0)                                   # ReLU

    logits = jnp.dot(w3_ref[...], h2, preferred_element_type=jnp.float32) + b3_ref[...]
    o_ref[...] = logits.astype(o_ref.dtype)                     # lane-dense store


def mlp_forward(x, params, *, batch_tile=2048):
    """x: (B, 3) float32.  Returns squeezed logits, matching torch.squeeze.

    params: (w1, b1, w2, b2, w3, b3) with PyTorch layout:
        w_i: (out_features, in_features), b_i: (out_features, 1).
    """
    w1, b1, w2, b2, w3, b3 = params
    B, in_f = x.shape
    out_f = w3.shape[0]

    # Layout plumbing: present the batch on the lane axis (feature-major).
    xt = x.T                                          # (3, B)

    # Tile selection:
    #  * B <= batch_tile  -> single full-array block (no padding, grid of 1).
    #  * B >  batch_tile  -> lane-dense tile (multiple of 128); grid >= 2 so
    #    both v7x TensorCores get work.
    if B <= batch_tile:
        tile = B
    else:
        tile = max(128, (batch_tile // 128) * 128)

    b_pad = pl.cdiv(B, tile) * tile
    if b_pad != B:
        # Only reached when B > tile and B is not a multiple of the tile.
        # Pick B as a multiple of batch_tile to keep this copy off the hot path.
        xt = jnp.pad(xt, ((0, 0), (0, b_pad - B)))

    grid = (b_pad // tile,)

    # Streamed activation spec; deepen buffering on multi-step grids.
    x_spec = pl.BlockSpec((in_f, tile), lambda i: (0, i))
    if grid[0] > 1:
        try:
            x_spec = pl.BlockSpec((in_f, tile), lambda i: (0, i),
                                  pipeline_mode=pl.Buffered(3))
        except (TypeError, AttributeError):
            pass  # older jax: fall back to default double-buffering

    # Weights/biases: full-array blocks with a constant index_map -> DMA'd once,
    # resident in VMEM for the whole grid.
    resident = lambda shape: pl.BlockSpec(shape, lambda i: (0, 0))

    out_t = pl.pallas_call(
        mlp_kernel,
        out_shape=jax.ShapeDtypeStruct((out_f, b_pad), jnp.float32),
        grid_spec=pltpu.PrefetchScalarGridSpec(
            num_scalar_prefetch=0,
            grid=grid,
            in_specs=[
                x_spec,
                resident(w1.shape), resident(b1.shape),
                resident(w2.shape), resident(b2.shape),
                resident(w3.shape), resident(b3.shape),
            ],
            out_specs=pl.BlockSpec((out_f, tile), lambda i: (0, i)),
        ),
        compiler_params=pltpu.CompilerParams(
            dimension_semantics=("parallel",)),
    )(xt, w1, b1, w2, b2, w3, b3)

    out = out_t[:, :B].T          # back to (B, 2)
    return jnp.squeeze(out)       # torch.squeeze: drop all size-1 dims


def init_params(key):
    """nn.Linear-style init, PyTorch layout: W (out,in), b (out,1)."""
    dims = [(3, 64), (64, 10), (10, 2)]
    params = []
    for (fan_in, fan_out) in dims:
        key, kw, kb = jax.random.split(key, 3)
        bound = 1.0 / jnp.sqrt(fan_in)
        w = jax.random.uniform(kw, (fan_out, fan_in), jnp.float32, -bound, bound)
        b = jax.random.uniform(kb, (fan_out, 1), jnp.float32, -bound, bound)
        params += [w, b]
    return tuple(params)


def reference_forward(x, params):
    """Plain-XLA reference (also the recommended path for a handful of rows)."""
    w1, b1, w2, b2, w3, b3 = params
    h1 = jnp.maximum(x @ w1.T + b1.T, 0.0)
    h2 = jnp.maximum(h1 @ w2.T + b2.T, 0.0)
    return jnp.squeeze(h2 @ w3.T + b3.T)


if __name__ == "__main__":
    key = jax.random.PRNGKey(0)
    key, kx1, kx2 = jax.random.split(key, 3)
    params = init_params(key)

    # Small demo batch (single full-array block, single grid step).
    x_small = jax.random.normal(kx1, (8, 3), dtype=jnp.float32)
    out_small = jax.block_until_ready(mlp_forward(x_small, params))
    ref_small = reference_forward(x_small, params)
    assert out_small.shape == ref_small.shape, (out_small.shape, ref_small.shape)
    assert jnp.allclose(out_small, ref_small, atol=1e-5, rtol=1e-5), "small-batch mismatch"

    # Moderately sized batch exercising the lane-dense multi-step grid path
    # (tile=128, grid=2 -> both TensorCores get work, Buffered(3) input).
    x_big = jax.random.normal(kx2, (256, 3), dtype=jnp.float32)
    out_big = jax.block_until_ready(mlp_forward(x_big, params, batch_tile=128))
    ref_big = reference_forward(x_big, params)
    assert out_big.shape == ref_big.shape, (out_big.shape, ref_big.shape)
    assert jnp.allclose(out_big, ref_big, atol=1e-5, rtol=1e-5), "tiled-path mismatch"

    print("KERNEL_OK")
</pallas_src>

<mosaic_0001>
module attributes {stable_mosaic.version = 11 : i64} {
  func.func @mlp_kernel(%arg0: i32, %arg1: memref<3x8xf32, #tpu.memory_space<vmem>>, %arg2: memref<64x3xf32, #tpu.memory_space<vmem>>, %arg3: memref<64x1xf32, #tpu.memory_space<vmem>>, %arg4: memref<10x64xf32, #tpu.memory_space<vmem>>, %arg5: memref<10x1xf32, #tpu.memory_space<vmem>>, %arg6: memref<2x10xf32, #tpu.memory_space<vmem>>, %arg7: memref<2x1xf32, #tpu.memory_space<vmem>>, %arg8: memref<2x8xf32, #tpu.memory_space<vmem>>) attributes {dimension_semantics = [#tpu.dimension_semantics<parallel>], iteration_bounds = array<i64: 1>, scalar_prefetch = 0 : i64, scratch_operands = 0 : i64, tpu.core_type = #tpu.core_type<tc>, window_params = [{transform_indices = @transform_0, window_bounds = array<i64: 3, 8>}, {pipeline_mode = #tpu.pipeline_mode<synchronous>, transform_indices = @transform_1, window_bounds = array<i64: 64, 3>}, {pipeline_mode = #tpu.pipeline_mode<synchronous>, transform_indices = @transform_2, window_bounds = array<i64: 64, 1>}, {pipeline_mode = #tpu.pipeline_mode<synchronous>, transform_indices = @transform_3, window_bounds = array<i64: 10, 64>}, {pipeline_mode = #tpu.pipeline_mode<synchronous>, transform_indices = @transform_4, window_bounds = array<i64: 10, 1>}, {pipeline_mode = #tpu.pipeline_mode<synchronous>, transform_indices = @transform_5, window_bounds = array<i64: 2, 10>}, {pipeline_mode = #tpu.pipeline_mode<synchronous>, transform_indices = @transform_6, window_bounds = array<i64: 2, 1>}, {transform_indices = @transform_7, window_bounds = array<i64: 2, 8>}]} {
    %c0 = arith.constant 0 : index
    %c0_0 = arith.constant 0 : index
    %0 = vector.load %arg1[%c0, %c0_0] : memref<3x8xf32, #tpu.memory_space<vmem>>, vector<3x8xf32>
    %c0_1 = arith.constant 0 : index
    %c0_2 = arith.constant 0 : index
    %1 = vector.load %arg2[%c0_1, %c0_2] : memref<64x3xf32, #tpu.memory_space<vmem>>, vector<64x3xf32>
    %cst = arith.constant dense<0.000000e+00> : vector<64x8xf32>
    %2 = tpu.matmul %1, %0, %cst {dimension_numbers = #tpu.dot_dimension_numbers<[1], [0], [0], [1], [0, 0, 1, 1], [], []>} : vector<64x3xf32>, vector<3x8xf32>, vector<64x8xf32> -> vector<64x8xf32>
    %c0_3 = arith.constant 0 : index
    %c0_4 = arith.constant 0 : index
    %3 = vector.load %arg3[%c0_3, %c0_4] : memref<64x1xf32, #tpu.memory_space<vmem>>, vector<64x1xf32>
    %4 = vector.broadcast %3 : vector<64x1xf32> to vector<64x8xf32>
    %5 = arith.addf %2, %4 : vector<64x8xf32>
    %cst_5 = arith.constant 0.000000e+00 : f32
    %6 = vector.broadcast %cst_5 : f32 to vector<64x8xf32>
    %7 = arith.maximumf %5, %6 : vector<64x8xf32>
    %c0_6 = arith.constant 0 : index
    %c0_7 = arith.constant 0 : index
    %8 = vector.load %arg4[%c0_6, %c0_7] : memref<10x64xf32, #tpu.memory_space<vmem>>, vector<10x64xf32>
    %cst_8 = arith.constant dense<0.000000e+00> : vector<10x8xf32>
    %9 = tpu.matmul %8, %7, %cst_8 {dimension_numbers = #tpu.dot_dimension_numbers<[1], [0], [0], [1], [0, 0, 1, 1], [], []>} : vector<10x64xf32>, vector<64x8xf32>, vector<10x8xf32> -> vector<10x8xf32>
    %c0_9 = arith.constant 0 : index
    %c0_10 = arith.constant 0 : index
    %10 = vector.load %arg5[%c0_9, %c0_10] : memref<10x1xf32, #tpu.memory_space<vmem>>, vector<10x1xf32>
    %11 = vector.broadcast %10 : vector<10x1xf32> to vector<10x8xf32>
    %12 = arith.addf %9, %11 : vector<10x8xf32>
    %cst_11 = arith.constant 0.000000e+00 : f32
    %13 = vector.broadcast %cst_11 : f32 to vector<10x8xf32>
    %14 = arith.maximumf %12, %13 : vector<10x8xf32>
    %c0_12 = arith.constant 0 : index
    %c0_13 = arith.constant 0 : index
    %15 = vector.load %arg6[%c0_12, %c0_13] : memref<2x10xf32, #tpu.memory_space<vmem>>, vector<2x10xf32>
    %cst_14 = arith.constant dense<0.000000e+00> : vector<2x8xf32>
    %16 = tpu.matmul %15, %14, %cst_14 {dimension_numbers = #tpu.dot_dimension_numbers<[1], [0], [0], [1], [0, 0, 1, 1], [], []>} : vector<2x10xf32>, vector<10x8xf32>, vector<2x8xf32> -> vector<2x8xf32>
    %c0_15 = arith.constant 0 : index
    %c0_16 = arith.constant 0 : index
    %17 = vector.load %arg7[%c0_15, %c0_16] : memref<2x1xf32, #tpu.memory_space<vmem>>, vector<2x1xf32>
    %18 = vector.broadcast %17 : vector<2x1xf32> to vector<2x8xf32>
    %19 = arith.addf %16, %18 : vector<2x8xf32>
    %c0_17 = arith.constant 0 : index
    %c0_18 = arith.constant 0 : index
    %20 = vector.load %arg8[%c0_17, %c0_18] : memref<2x8xf32, #tpu.memory_space<vmem>>, vector<2x8xf32>
    tpu.vector_store %arg8[%c0_17, %c0_18], %19 {strides = array<i32>} : memref<2x8xf32, #tpu.memory_space<vmem>>, vector<2x8xf32>,
    return
  }
  func.func @transform_0(%arg0: i32) -> (i32, i32) {
    %c0_i32 = arith.constant 0 : i32
    %c0_i32_0 = arith.constant 0 : i32
    return %c0_i32, %arg0 : i32, i32
  }
  func.func @transform_1(%arg0: i32) -> (i32, i32) {
    %c0_i32 = arith.constant 0 : i32
    %c0_i32_0 = arith.constant 0 : i32
    %c0_i32_1 = arith.constant 0 : i32
    return %c0_i32, %c0_i32_0 : i32, i32
  }
  func.func @transform_2(%arg0: i32) -> (i32, i32) {
    %c0_i32 = arith.constant 0 : i32
    %c0_i32_0 = arith.constant 0 : i32
    %c0_i32_1 = arith.constant 0 : i32
    return %c0_i32, %c0_i32_0 : i32, i32
  }
  func.func @transform_3(%arg0: i32) -> (i32, i32) {
    %c0_i32 = arith.constant 0 : i32
    %c0_i32_0 = arith.constant 0 : i32
    %c0_i32_1 = arith.constant 0 : i32
    return %c0_i32, %c0_i32_0 : i32, i32
  }
  func.func @transform_4(%arg0: i32) -> (i32, i32) {
    %c0_i32 = arith.constant 0 : i32
    %c0_i32_0 = arith.constant 0 : i32
    %c0_i32_1 = arith.constant 0 : i32
    return %c0_i32, %c0_i32_0 : i32, i32
  }
  func.func @transform_5(%arg0: i32) -> (i32, i32) {
    %c0_i32 = arith.constant 0 : i32
    %c0_i32_0 = arith.constant 0 : i32
    %c0_i32_1 = arith.constant 0 : i32
    return %c0_i32, %c0_i32_0 : i32, i32
  }
  func.func @transform_6(%arg0: i32) -> (i32, i32) {
    %c0_i32 = arith.constant 0 : i32
    %c0_i32_0 = arith.constant 0 : i32
    %c0_i32_1 = arith.constant 0 : i32
    return %c0_i32, %c0_i32_0 : i32, i32
  }
  func.func @transform_7(%arg0: i32) -> (i32, i32) {
    %c0_i32 = arith.constant 0 : i32
    %c0_i32_0 = arith.constant 0 : i32
    return %c0_i32, %arg0 : i32, i32
  }
}

</mosaic_0001>

<bundles_post_ra>
// kernel: tpu_custom_call.1
= control target key start
LH: loop header
LB: loop body
LE: loop exit
PB: predicated region body
PF: predicated region fallthrough
CT: control target
= control target key end

     0   :  { %vm109_vm0 = vcmask 1042432   ;;  %vm84_vm1 = vcmask 23552   ;;  %v552_v4 = vmov 0   ;;  %s689_s0 = inlined_call_operand.vmem [shape: f32[3,8], index: 0, kind: input, shape index: {}]   ;;  %s690_s1 = inlined_call_operand.vmem [shape: f32[64,3], index: 1, kind: input, shape index: {}]   ;;  %s691_s2 = inlined_call_operand.vmem [shape: f32[64,1], index: 2, kind: input, shape index: {}]   ;;  %s692_s3 = inlined_call_operand.vmem [shape: f32[10,64], index: 3, kind: input, shape index: {}]   ;;  %s693_s4 = inlined_call_operand.vmem [shape: f32[10,1], index: 4, kind: input, shape index: {}]   ;;  %s694_s5 = inlined_call_operand.vmem [shape: f32[2,10], index: 5, kind: input, shape index: {}]   ;;  %s695_s6 = inlined_call_operand.vmem [shape: f32[2,1], index: 6, kind: input, shape index: {}]   ;;  %s696_s7 = inlined_call_operand.hbm [shape: f32[2,8], index: 7, kind: output, shape index: {}]  }
   0x1   :  { %v27_v0 = vld [vmem:[%s689_s0] sm:$0x7]  ;;  %v29_v2 = vld [vmem:[%s690_s1 + $0x8] sm:$0xff]  ;;  %v30_v3 = vld [vmem:[%s690_s1 + $0x10] sm:$0xff]  ;;  %526 = vset.pattern.permute.xlu0 %v552_v4  ;;  %527 = vset.pattern.permute.xlu1 %v552_v4 }
   0x2   :  { %v28_v1 = vld [vmem:[%s690_s1] sm:$0xff]  ;;  %460 = vmatprep.subr.msk.mxu0 %vm109_vm0, %v27_v0  ;;  %v38_v6 = vld [vmem:[%s691_s2 + $0x10] sm:$0xff]  ;;  %v31_v7 = vld [vmem:[%s690_s1 + $0x18] sm:$0xff] }
   0x3   :  { %462 = vmatprep.mubr.msk.f32.mxu0 %vm84_vm1, %v28_v1  ;;  %461 = vmatpush3.msk.msra.mxu0 %vm109_vm0, %v27_v0  ;;  %v36_v5 = vld [vmem:[%s691_s2] sm:$0xff]  ;;  %v37_v9 = vld [vmem:[%s691_s2 + $0x8] sm:$0xff]  ;;  %v39_v10 = vld [vmem:[%s691_s2 + $0x18] sm:$0xff] }
   0x4   :  { %463 = vmatmul.mubr.msk.f32.vlgmr.msra.gmra.mrb[0].mxu0 %vm84_vm1, %v29_v2  ;;  %46 = vperm.xlu0 %526, %v36_v5   ;;  %v32_v8 = vld [vmem:[%s690_s1 + $0x20] sm:$0xff] }
   0x5   :  { %465 = vmatprep.mubr.msk.f32.mxu0 %vm84_vm1, %v30_v3  ;;  %56 = vperm.xlu1 %527, %v38_v6  }
   0x6   :  { %12 = vsyncpa [#allocation3], 0  ;;  %v33_v11 = vld [vmem:[%s690_s1 + $0x28] sm:$0xff]  ;;  %v34_v12 = vld [vmem:[%s690_s1 + $0x30] sm:$0xff]  ;;  %vm240_vm2 = vcmask 523264   ;;  %v553_v59 = vmov 0.0|0.0  }
   0x7   :  { %v40_v13 = vld [vmem:[%s691_s2 + $0x20] sm:$0xff]  ;;  %v41_v14 = vld [vmem:[%s691_s2 + $0x28] sm:$0xff]  ;;  %v35_v15 = vld [vmem:[%s690_s1 + $0x38] sm:$0xff]  ;;  %516 = vmatprep.subr.bf16.mxu0 %v553_v59  ;;  %vm554_vm3 = vmmov 0   ;;  %v555_v60 = vmov 0.0   ;;  %vm335_vm4 = vcmask 1041408  }
   0x8   :  { %466 = vmatmul.mubr.msk.f32.gmra.mrb[2].mxu0 %vm84_vm1, %v31_v7  ;;  %51 = vperm.xlu0 %526, %v37_v9   ;;  %v42_v16 = vld [vmem:[%s691_s2 + $0x30] sm:$0xff]  ;;  %v43_v17 = vld [vmem:[%s691_s2 + $0x38] sm:$0xff]  ;;  %v228_v18 = vld [vmem:[%s693_s4] sm:$0xff]  ;;  %vm556_vm5 = vmmov 1   ;;  %vm331_vm7 = vcmask 80896   ;;  %s557_s17 = smov [#allocation2]  }
   0x9   :  { %468 = vmatprep.mubr.msk.f32.mxu0 %vm84_vm1, %v32_v8  ;;  %61 = vperm.xlu1 %527, %v39_v10   ;;  %v229_v19 = vld [vmem:[%s693_s4 + $0x8] sm:$0x3]  ;;  %v325_v20 = vld [vmem:[%s695_s6] sm:$0x3]  ;;  %vm518_vm6 = vmpackc.low %vm335_vm4, %vm556_vm5  ;;  %s417_s18 = sshll.u32 %s557_s17, 4  ;;  %vm409_vm8 = vcmask 58368   ;;  %s418_s18 = int_to_ptr.vmem [resolvable:$true] %s417_s18 }
   0xa   :  { %v226_v21 = vld [vmem:[%s692_s3] sm:$0xff]  ;;  %v227_v58 = vld [vmem:[%s692_s3 + $0x8] sm:$0x3]  ;;  %s528_s19 = scalar_lea.vmem %s418_s18, 32  ;;  %p533_p1 = scmp.lt.s32.totalorder %s418_s18, %s418_s18 }
   0xb   :  { %490 = vmatprep.mubr.msk.f32.mxu1 %vm240_vm2, %v226_v21  ;;  %v324_v6 = vld [vmem:[%s694_s5] sm:$0x3]  ;;  %p529_p0 = scmp.ne.s32.totalorder %s418_s18, %s528_s19  ;;  %p534_p2 = scmp.lt.s32.totalorder %s528_s19, %s528_s19 }
   0xc   :  { %469 = vmatmul.mubr.msk.f32.gmra.mrb[4].mxu0 %vm84_vm1, %v33_v11  ;;  %66 = vperm.xlu0 %526, %v40_v13  }
   0xd   :  { %471 = vmatprep.mubr.msk.f32.mxu0 %vm84_vm1, %v34_v12  ;;  %71 = vperm.xlu1 %527, %v41_v14   ;;  %p535_p3 = por %p534_p2, %p533_p1 }
   0xf   :  { %p536_p4 = pnand %p535_p3, %p529_p0 }
  0x10   :  { %472 = vmatmul.mubr.msk.f32.gmra.mrb[6].mxu0 %vm84_vm1, %v35_v15  ;;  %76 = vperm.xlu0 %526, %v42_v16  }
  0x11   :  { %81 = vperm.xlu1 %527, %v43_v17   ;;  %497 = vmatprep.mubr.msk.f32.mxu0 %vm554_vm3, %v555_v60 }
  0x14   :  { %232 = vperm.xlu0 %526, %v228_v18  }
  0x15   :  { %237 = vperm.xlu1 %527, %v229_v19  }
  0x18   :  { %328 = vperm.xlu0 %526, %v325_v20  }
  0x83   :  { %v47_v22 = vpop.permute.xlu0 %46 }
  0x84   :  { %v57_v23 = vpop.permute.xlu1 %56 }
  0x87   :  { %v52_v24 = vpop.permute.xlu0 %51 }
  0x88   :  { %v62_v25 = vpop.permute.xlu1 %61 }
  0x8b   :  { %v67_v38 = vpop.permute.xlu0 %66 }
  0x8c   :  { %v72_v35 = vpop.permute.xlu1 %71 }
  0x8f   :  { %v77_v50 = vpop.permute.xlu0 %76 }
  0x90   :  { %v82_v47 = vpop.permute.xlu1 %81 }
  0x93   :  { %v233_v63 = vpop.permute.xlu0 %232 }
  0x94   :  { %v238_v61 = vpop.permute.xlu1 %237 }
  0x97   :  { %v329_v7 = vpop.permute.xlu0 %328 }
  0xd7   :  { %v464_v26 = vpop.f32.mrb[0].mxu0 }
  0xd8   :  { %v185_v27 = vadd.f32 %v464_v26, %v52_v24  ;;  %v179_v28 = vpop.f32.mrb[1].mxu0 }
  0xd9   :  { %v180_v29 = vadd.f32 %v179_v28, %v47_v22 }
  0xda   :  { %v219_v30 = vmax.f32 %v185_v27, 0.0 }
  0xdb   :  { %v218_v31 = vmax.f32 %v180_v29, 0.0  ;;  %v467_v32 = vpop.f32.mrb[2].mxu0 }
  0xdc   :  { %v195_v33 = vadd.f32 %v467_v32, %v62_v25  ;;  %v189_v34 = vpop.f32.mrb[3].mxu0 }
  0xdd   :  { %v190_v36 = vadd.f32 %v189_v34, %v57_v23  ;;  %v500_v37 = vpack.c.bf16 %v219_v30, %v218_v31 }
  0xde   :  { %v221_v39 = vmax.f32 %v195_v33, 0.0 }
  0xdf   :  { %v220_v40 = vmax.f32 %v190_v36, 0.0  ;;  %v470_v41 = vpop.f32.mrb[4].mxu0  ;;  %501 = vmatprep.subr.bf16.mxu1 %v500_v37 }
  0xe0   :  { %v205_v42 = vadd.f32 %v470_v41, %v72_v35  ;;  %v199_v43 = vpop.f32.mrb[5].mxu0  ;;  %503 = vmatpush3.bf16.msra.mxu1 %v500_v37 }
  0xe1   :  { %v504_v44 = vpack.c.bf16 %v221_v39, %v220_v40  ;;  %v200_v45 = vadd.f32 %v199_v43, %v67_v38 }
  0xe2   :  { %v223_v46 = vmax.f32 %v205_v42, 0.0 }
  0xe3   :  { %v222_v48 = vmax.f32 %v200_v45, 0.0  ;;  %v473_v49 = vpop.f32.mrb[6].mxu0  ;;  %505 = vmatprep.subr.bf16.mxu1 %v504_v44 }
  0xe4   :  { %v215_v51 = vadd.f32 %v473_v49, %v82_v47  ;;  %v209_v52 = vpop.f32.mrb[7].mxu0  ;;  %507 = vmatpush3.bf16.msra.mxu1 %v504_v44 }
  0xe5   :  { %v508_v53 = vpack.c.bf16 %v223_v46, %v222_v48  ;;  %v210_v54 = vadd.f32 %v209_v52, %v77_v50 }
  0xe6   :  { %v225_v55 = vmax.f32 %v215_v51, 0.0 }
  0xe7   :  { %v224_v56 = vmax.f32 %v210_v54, 0.0  ;;  %509 = vmatprep.subr.bf16.mxu1 %v508_v53 }
  0xe8   :  { %511 = vmatpush3.bf16.msra.mxu1 %v508_v53 }
  0xe9   :  { %v512_v57 = vpack.c.bf16 %v225_v55, %v224_v56 }
  0xeb   :  { %513 = vmatprep.subr.bf16.mxu1 %v512_v57 }
  0xec   :  { %515 = vmatpush3.bf16.msra.mxu1 %v512_v57 }
  0xef   :  { %491 = vmatmul.mubr.msk.f32.vlgmr.msra.gmra.mrb[0].mxu1 %vm240_vm2, %v227_v58 }
 0x1c2   :  { %v492_v62 = vpop.f32.mrb[0].mxu1 }
 0x1c3   :  { %v319_v0 = vadd.f32 %v492_v62, %v238_v61  ;;  %v313_v1 = vpop.f32.mrb[1].mxu1 }
 0x1c4   :  { %v314_v2 = vadd.f32 %v313_v1, %v233_v63 }
 0x1c5   :  { %v323_v3 = vmax.f32 %v319_v0, 0.0 }
 0x1c6   :  { %v322_v4 = vmax.f32 %v314_v2, 0.0 }
 0x1c8   :  { %v517_v5 = vpack.c.bf16 %v323_v3, %v322_v4 }
 0x1ca   :  { %519 = vmatpush3.bf16.msk.msra.mxu0 %vm518_vm6, %v517_v5 }
 0x1cd   :  { %498 = vmatmul.mubr.msk.f32.vlgmr.msra.gmra.mrb[8].mxu0 %vm331_vm7, %v324_v6 }
 0x2a0   :  { %v405_v8 = vpop.f32.mrb[8].mxu0 }
 0x2a1   :  { %v406_v9 = vadd.f32 %v405_v8, %v329_v7  ;;  %v499_v10 = vpop.f32.mrb[9].mxu0 }
 0x2a3   :  { %410 = vst.msk [vmem:[#allocation2] sm:$0x3] %vm409_vm8, %v406_v9 }
 0x2a4   :  { %539 = shalt.err (!%p536_p4)
}
 0x2a5   :  { %s540_s21 = scalar_lea.hbm %s696_s7, 32 }
 0x2a6   :  { %p541_p5 = scmp.ne.s32.totalorder %s696_s7, %s540_s21  ;;  %p544_p6 = scmp.lt.u32.totalorder %s540_s21, %s696_s7 }
 0x2a8   :  { %p546_p7 = pnand %p544_p6, %p541_p5 }
 0x2aa   :  { %549 = shalt.err (!%p546_p7)
}
 0x2ab   :  { %420 = dma.vmem_to_hbm [thread:$0]  %s418_s18, 32, %s696_s7, [#allocation3]  }
 0x2ac   :  { %550 = dma.done.wait [#allocation3], 32  }
 0x2ad   :  { %551 = vsyncadd [#allocation3], 4294967264 }
 0x2ae   :  { %424 = vsyncpa [#allocation3], 1 }

</bundles_post_ra>
